<compile_context>
chip_gen: v7x
topology: tpu7x:2x2x1
jax: 0.10.0
libtpu: 0.0.40
codegen_flags: <defaults>
</compile_context>

<pallas_src>
import functools

import jax
import jax.numpy as jnp
import numpy as np
from jax.experimental import pallas as pl
from jax.experimental.pallas import tpu as pltpu


def _round_up(v, m):
    return (v + m - 1) // m * m


def _pick_tile_n(p, c_pad, k_pad, max_tile=4096, budget_bytes=16 << 20):
    """Largest lane-aligned divisor of `p` whose per-step VMEM estimate fits."""
    if p % 128 != 0:
        # Full-row block: last dim equals the array dim, so it is a legal
        # (masked-store) block.  TODO(synk): for very large non-128-aligned H*W
        # this should fall back to padding the token axis instead.
        return p

    def fits(tn):
        io = 2 * (2 * c_pad * tn * 4) + 2 * tn * 4   # x + quant (double-buffered) + ids
        tmp = 4 * k_pad * tn * 4                     # scores / onehot / argmin temporaries
        return io + tmp <= budget_bytes

    best = 128
    tn = 128
    while tn <= min(p, max_tile):
        if p % tn == 0 and fits(tn):
            best = tn
        tn += 128
    return best


def _vq_kernel(x_ref, e_kd_ref, e_dk_ref, esq_ref, ids_ref, quant_ref, sse_ref,
               *, num_ch):
    x = x_ref[0]                 # (C_pad, TN)  tokens along lanes
    e_kd = e_kd_ref[...]         # (K_pad, C_pad)  codebook
    e_dk = e_dk_ref[...]         # (C_pad, K_pad)  codebook, pre-transposed
    esq_half = esq_ref[...]      # (K_pad, 1)  0.5*||e_k||^2 (1e30 on padded codes)

    # L2 argmin over codes == argmax_k ( e_k . x - 0.5*||e_k||^2 );
    # the ||x||^2 term is constant per token and the 2x scale is folded away.
    scores = jnp.dot(e_kd, x, preferred_element_type=jnp.float32) - esq_half   # (K_pad, TN)

    kpad = scores.shape[0]
    iota_k = jax.lax.broadcasted_iota(jnp.int32, (kpad, 1), 0)   # column iota, broadcast in-reg
    m = jnp.max(scores, axis=0, keepdims=True)                   # (1, TN)
    # first-max tie-break (same as argmax): smallest index among the maxima
    ids = jnp.min(jnp.where(scores >= m, iota_k, kpad), axis=0, keepdims=True)  # (1, TN) i32
    ids_ref[0] = ids

    # codebook gather via one-hot matmul (MXU-friendly, lane-dense)
    onehot = (iota_k == ids).astype(jnp.float32)                 # (K_pad, TN)
    q = jnp.dot(e_dk, onehot, preferred_element_type=jnp.float32)  # (C_pad, TN)
    quant_ref[0] = q if num_ch == q.shape[0] else q[:num_ch, :]

    # per-tile partial SSE for F.mse_loss(input, quantized); padded channel rows
    # are zero in both x and q, so they contribute nothing.
    d = x - q
    sse = jnp.sum(jnp.sum(d * d, axis=1, keepdims=True), axis=0, keepdims=True)  # (1, 1)
    sse_ref[...] = sse[None, None]                                # (1, 1, 1, 1)


def vq_forward(x, embed, *, max_tile=4096):
    """Mirrors VQModule.forward: returns (quantized, commit_loss, ids)."""
    B, C, H, W = x.shape
    K, d_e = embed.shape
    assert d_e == C
    P = H * W
    N = B * P

    C_pad = _round_up(max(C, 8), 8)     # matmul contraction dim (sublane aligned)
    K_pad = _round_up(max(K, 8), 8)     # codebook rows only need sublane alignment

    # Free reshape: NCHW -> (B, C, H*W), tokens along the last (lane) axis.
    x_flat = x.astype(jnp.float32).reshape(B, C, P)
    if C_pad != C:
        # TODO(synk): emb_dim not a multiple of 8 costs one extra HBM pass to pad
        # the channel axis; aligned emb_dim takes the zero-copy fast path.
        x_flat = jnp.pad(x_flat, ((0, 0), (0, C_pad - C), (0, 0)))

    e_kd = jnp.pad(embed.astype(jnp.float32),
                   ((0, K_pad - K), (0, C_pad - C)))              # (K_pad, C_pad)
    e_dk = e_kd.T                                                  # (C_pad, K_pad)
    esq_half = 0.5 * jnp.sum(e_kd * e_kd, axis=1, keepdims=True)   # (K_pad, 1)
    code_valid = jax.lax.broadcasted_iota(jnp.int32, (K_pad, 1), 0) < K
    esq_half = jnp.where(code_valid, esq_half, jnp.float32(1e30))  # padded codes never win

    tile_n = _pick_tile_n(P, C_pad, K_pad, max_tile)
    num_tiles = P // tile_n

    kernel = functools.partial(_vq_kernel, num_ch=C)

    ids_out, quant_out, sse_parts = pl.pallas_call(
        kernel,
        out_shape=(
            jax.ShapeDtypeStruct((B, 1, P), jnp.int32),               # lane-dense ids
            jax.ShapeDtypeStruct((B, C, P), jnp.float32),             # lane-dense quantized
            jax.ShapeDtypeStruct((B, num_tiles, 1, 1), jnp.float32),  # per-tile SSE partials
        ),
        grid_spec=pltpu.PrefetchScalarGridSpec(
            num_scalar_prefetch=0,
            grid=(B, num_tiles),
            in_specs=[
                pl.BlockSpec((1, C_pad, tile_n), lambda b, i: (b, 0, i)),
                # Constant codebook blocks (index_map always (0, 0)); footprint is
                # tiny here, so default double-buffering is fine.  For very large
                # codebooks these could be single-buffered / folded into e_kd.
                pl.BlockSpec((K_pad, C_pad), lambda b, i: (0, 0)),
                pl.BlockSpec((C_pad, K_pad), lambda b, i: (0, 0)),
                pl.BlockSpec((K_pad, 1), lambda b, i: (0, 0)),
            ],
            out_specs=[
                pl.BlockSpec((1, 1, tile_n), lambda b, i: (b, 0, i)),
                pl.BlockSpec((1, C, tile_n), lambda b, i: (b, 0, i)),
                pl.BlockSpec((1, 1, 1, 1), lambda b, i: (b, i, 0, 0)),
            ],
        ),
        compiler_params=pltpu.CompilerParams(
            # no cross-step state -> both grid axes can shard across v7x's 2 TCs
            dimension_semantics=("parallel", "parallel"),
            vmem_limit_bytes=48 * 1024 * 1024,
        ),
    )(x_flat, e_kd, e_dk, esq_half)

    # Natural-order results (token = spatial (h, w) scan of NCHW).
    ids_grid = ids_out.reshape(B, H, W)          # ids_grid[b, h, w]
    quant_grid = quant_out.reshape(B, C, H, W)   # free reshape

    # F.mse_loss(input, quantized): mean over all B*C*H*W elements.
    commit_loss = jnp.sum(sse_parts) / (N * C)

    # torch layout quirk: ids are flattened in (b, w, h) order then viewed as
    # (B, H, W); equivalently: transpose the natural grid and reinterpret.
    ids = jnp.transpose(ids_grid, (0, 2, 1)).reshape(B, H, W)

    if H == W:
        # The module's double transpose quirk cancels for square inputs, so the
        # natural (B, C, H, W) slab IS the torch (B, C, W, H) output -- zero-copy.
        quantized = quant_grid
    else:
        # TODO(synk): non-square inputs keep torch's flat-reinterpretation quirk,
        # which costs one extra transpose round trip here.
        quantized = jnp.transpose(
            jnp.transpose(quant_grid, (0, 1, 3, 2)).reshape(B, C, H, W),
            (0, 1, 3, 2))

    # TODO(synk): custom_straight_through_estimator only changes gradients; its
    # forward value is `quantized`, so it is the identity here.
    # TODO(synk): training-mode EMA buffer updates (cluster_size / embed_avg /
    # embed) are not implemented; they do not affect the forward outputs.
    return quantized, commit_loss, ids


def _reference(x, embed):
    """Plain-JAX mirror of the torch forward math, for checking."""
    B, C, H, W = x.shape
    flatten = jnp.transpose(x, (0, 3, 2, 1)).reshape(-1, C)
    scores = 2.0 * flatten @ embed.T - jnp.sum(embed * embed, axis=1)[None, :]
    ids_flat = jnp.argmax(scores, axis=1)
    q_flat = embed[ids_flat]
    loss = jnp.mean((flatten - q_flat) ** 2)
    ids = ids_flat.reshape(B, H, W)
    quant = jnp.transpose(q_flat.reshape(B, H, W, C), (0, 3, 2, 1))
    return quant, loss, ids


if __name__ == "__main__":
    key = jax.random.PRNGKey(0)
    k_x, k_e, k_x2, k_e2 = jax.random.split(key, 4)

    # Fast path: emb_dim multiple of 8, square spatial -> zero-copy in/out.
    B, C, H, W = 2, 8, 16, 16       # emb_dim = C = 8
    dict_size = 64
    x = jax.random.normal(k_x, (B, C, H, W), dtype=jnp.float32)
    embed = jax.random.normal(k_e, (dict_size, C), dtype=jnp.float32)

    quantized, commit_loss, ids = jax.block_until_ready(vq_forward(x, embed))
    ref_q, ref_loss, ref_ids = _reference(x, embed)

    assert quantized.shape == (B, C, W, H)
    assert ids.shape == (B, H, W)
    np.testing.assert_array_equal(np.asarray(ids), np.asarray(ref_ids))
    np.testing.assert_allclose(np.asarray(quantized), np.asarray(ref_q),
                               rtol=1e-5, atol=1e-5)
    np.testing.assert_allclose(float(commit_loss), float(ref_loss),
                               rtol=1e-4, atol=1e-6)

    # Fallback path: emb_dim=4 (channel pad), non-square spatial, ragged token
    # axis (H*W = 120 not a multiple of 128), codebook size not a multiple of 8.
    x2 = jax.random.normal(k_x2, (2, 4, 10, 12), dtype=jnp.float32)
    embed2 = jax.random.normal(k_e2, (50, 4), dtype=jnp.float32)
    q2, loss2, ids2 = jax.block_until_ready(vq_forward(x2, embed2))
    r_q2, r_loss2, r_ids2 = _reference(x2, embed2)

    assert q2.shape == (2, 4, 12, 10)
    assert ids2.shape == (2, 10, 12)
    np.testing.assert_array_equal(np.asarray(ids2), np.asarray(r_ids2))
    np.testing.assert_allclose(np.asarray(q2), np.asarray(r_q2), rtol=1e-5, atol=1e-5)
    np.testing.assert_allclose(float(loss2), float(r_loss2), rtol=1e-4, atol=1e-6)

    print("KERNEL_OK")
</pallas_src>

<mosaic_0001>
module attributes {stable_mosaic.version = 11 : i64} {
  func.func @_vq_kernel(%arg0: i32, %arg1: i32, %arg2: memref<1x8x256xf32, #tpu.memory_space<vmem>>, %arg3: memref<64x8xf32, #tpu.memory_space<vmem>>, %arg4: memref<8x64xf32, #tpu.memory_space<vmem>>, %arg5: memref<64x1xf32, #tpu.memory_space<vmem>>, %arg6: memref<1x1x256xi32, #tpu.memory_space<vmem>>, %arg7: memref<1x8x256xf32, #tpu.memory_space<vmem>>, %arg8: memref<1x1x1x1xf32, #tpu.memory_space<vmem>>) attributes {dimension_semantics = [#tpu.dimension_semantics<parallel>, #tpu.dimension_semantics<parallel>], iteration_bounds = array<i64: 2, 1>, scalar_prefetch = 0 : i64, scratch_operands = 0 : i64, tpu.core_type = #tpu.core_type<tc>, window_params = [{transform_indices = @transform_0, window_bounds = array<i64: 1, 8, 256>}, {pipeline_mode = #tpu.pipeline_mode<synchronous>, transform_indices = @transform_1, window_bounds = array<i64: 64, 8>}, {pipeline_mode = #tpu.pipeline_mode<synchronous>, transform_indices = @transform_2, window_bounds = array<i64: 8, 64>}, {pipeline_mode = #tpu.pipeline_mode<synchronous>, transform_indices = @transform_3, window_bounds = array<i64: 64, 1>}, {transform_indices = @transform_4, window_bounds = array<i64: 1, 1, 256>}, {transform_indices = @transform_5, window_bounds = array<i64: 1, 8, 256>}, {transform_indices = @transform_6, window_bounds = array<i64: 1, 1, 1, 1>}]} {
    %c0 = arith.constant 0 : index
    %c0_0 = arith.constant 0 : index
    %c0_1 = arith.constant 0 : index
    %0 = vector.load %arg2[%c0, %c0_0, %c0_1] : memref<1x8x256xf32, #tpu.memory_space<vmem>>, vector<1x8x256xf32>
    %1 = vector.shape_cast %0 : vector<1x8x256xf32> to vector<8x256xf32>
    %c0_2 = arith.constant 0 : index
    %c0_3 = arith.constant 0 : index
    %2 = vector.load %arg3[%c0_2, %c0_3] : memref<64x8xf32, #tpu.memory_space<vmem>>, vector<64x8xf32>
    %c0_4 = arith.constant 0 : index
    %c0_5 = arith.constant 0 : index
    %3 = vector.load %arg4[%c0_4, %c0_5] : memref<8x64xf32, #tpu.memory_space<vmem>>, vector<8x64xf32>
    %c0_6 = arith.constant 0 : index
    %c0_7 = arith.constant 0 : index
    %4 = vector.load %arg5[%c0_6, %c0_7] : memref<64x1xf32, #tpu.memory_space<vmem>>, vector<64x1xf32>
    %cst = arith.constant dense<0.000000e+00> : vector<64x256xf32>
    %5 = tpu.matmul %2, %1, %cst {dimension_numbers = #tpu.dot_dimension_numbers<[1], [0], [0], [1], [0, 0, 1, 1], [], []>} : vector<64x8xf32>, vector<8x256xf32>, vector<64x256xf32> -> vector<64x256xf32>
    %6 = vector.broadcast %4 : vector<64x1xf32> to vector<64x256xf32>
    %7 = arith.subf %5, %6 : vector<64x256xf32>
    %8 = tpu.iota {dimensions = array<i32: 0>} : vector<64x1xi32>
    %cst_8 = arith.constant dense<0xFF800000> : vector<256xf32>
    %9 = vector.multi_reduction <maximumf>, %7, %cst_8 [0] : vector<64x256xf32> to vector<256xf32>
    %10 = vector.shape_cast %9 : vector<256xf32> to vector<1x256xf32>
    %11 = vector.broadcast %10 : vector<1x256xf32> to vector<64x256xf32>
    %12 = arith.cmpf oge, %7, %11 : vector<64x256xf32>
    %c64_i32 = arith.constant 64 : i32
    %13 = vector.shape_cast %8 : vector<64x1xi32> to vector<64x1xi32>
    %14 = vector.broadcast %13 : vector<64x1xi32> to vector<64x256xi32>
    %15 = vector.broadcast %c64_i32 : i32 to vector<64x256xi32>
    %16 = arith.select %12, %14, %15 : vector<64x256xi1>, vector<64x256xi32>
    %cst_9 = arith.constant dense<2147483647> : vector<256xi32>
    %17 = vector.multi_reduction <minsi>, %16, %cst_9 [0] : vector<64x256xi32> to vector<256xi32>
    %18 = vector.shape_cast %17 : vector<256xi32> to vector<1x256xi32>
    %c0_10 = arith.constant 0 : index
    %c0_11 = arith.constant 0 : index
    %c0_12 = arith.constant 0 : index
    %19 = vector.load %arg6[%c0_10, %c0_11, %c0_12] : memref<1x1x256xi32, #tpu.memory_space<vmem>>, vector<1x1x256xi32>
    %20 = vector.shape_cast %19 : vector<1x1x256xi32> to vector<1x256xi32>
    %21 = vector.shape_cast %18 : vector<1x256xi32> to vector<1x1x256xi32>
    tpu.vector_store %arg6[%c0_10, %c0_11, %c0_12], %21 {strides = array<i32>} : memref<1x1x256xi32, #tpu.memory_space<vmem>>, vector<1x1x256xi32>,
    %22 = vector.broadcast %8 : vector<64x1xi32> to vector<64x256xi32>
    %23 = vector.broadcast %18 : vector<1x256xi32> to vector<64x256xi32>
    %24 = arith.cmpi eq, %22, %23 : vector<64x256xi32>
    %25 = arith.extui %24 : vector<64x256xi1> to vector<64x256xi32>
    %26 = arith.sitofp %25 : vector<64x256xi32> to vector<64x256xf32>
    %cst_13 = arith.constant dense<0.000000e+00> : vector<8x256xf32>
    %27 = tpu.matmul %3, %26, %cst_13 {dimension_numbers = #tpu.dot_dimension_numbers<[1], [0], [0], [1], [0, 0, 1, 1], [], []>} : vector<8x64xf32>, vector<64x256xf32>, vector<8x256xf32> -> vector<8x256xf32>
    %c0_14 = arith.constant 0 : index
    %c0_15 = arith.constant 0 : index
    %c0_16 = arith.constant 0 : index
    %28 = vector.load %arg7[%c0_14, %c0_15, %c0_16] : memref<1x8x256xf32, #tpu.memory_space<vmem>>, vector<1x8x256xf32>
    %29 = vector.shape_cast %28 : vector<1x8x256xf32> to vector<8x256xf32>
    %30 = vector.shape_cast %27 : vector<8x256xf32> to vector<1x8x256xf32>
    tpu.vector_store %arg7[%c0_14, %c0_15, %c0_16], %30 {strides = array<i32>} : memref<1x8x256xf32, #tpu.memory_space<vmem>>, vector<1x8x256xf32>,
    %31 = arith.subf %1, %27 : vector<8x256xf32>
    %32 = arith.mulf %31, %31 : vector<8x256xf32>
    %cst_17 = arith.constant dense<0.000000e+00> : vector<8xf32>
    %33 = vector.multi_reduction <add>, %32, %cst_17 [1] : vector<8x256xf32> to vector<8xf32>
    %34 = vector.shape_cast %33 : vector<8xf32> to vector<8x1xf32>
    %cst_18 = arith.constant dense<0.000000e+00> : vector<1xf32>
    %35 = vector.multi_reduction <add>, %34, %cst_18 [0] : vector<8x1xf32> to vector<1xf32>
    %36 = vector.shape_cast %35 : vector<1xf32> to vector<1x1xf32>
    %37 = vector.shape_cast %36 : vector<1x1xf32> to vector<1x1x1x1xf32>
    %c0_19 = arith.constant 0 : index
    %c0_20 = arith.constant 0 : index
    %c0_21 = arith.constant 0 : index
    %c0_22 = arith.constant 0 : index
    %38 = vector.load %arg8[%c0_19, %c0_20, %c0_21, %c0_22] : memref<1x1x1x1xf32, #tpu.memory_space<vmem>>, vector<1x1x1x1xf32>
    tpu.vector_store %arg8[%c0_19, %c0_20, %c0_21, %c0_22], %37 {strides = array<i32>} : memref<1x1x1x1xf32, #tpu.memory_space<vmem>>, vector<1x1x1x1xf32>,
    return
  }
  func.func @transform_0(%arg0: i32, %arg1: i32) -> (i32, i32, i32) {
    %c0_i32 = arith.constant 0 : i32
    %c0_i32_0 = arith.constant 0 : i32
    return %arg0, %c0_i32, %arg1 : i32, i32, i32
  }
  func.func @transform_1(%arg0: i32, %arg1: i32) -> (i32, i32) {
    %c0_i32 = arith.constant 0 : i32
    %c0_i32_0 = arith.constant 0 : i32
    %c0_i32_1 = arith.constant 0 : i32
    return %c0_i32, %c0_i32_0 : i32, i32
  }
  func.func @transform_2(%arg0: i32, %arg1: i32) -> (i32, i32) {
    %c0_i32 = arith.constant 0 : i32
    %c0_i32_0 = arith.constant 0 : i32
    %c0_i32_1 = arith.constant 0 : i32
    return %c0_i32, %c0_i32_0 : i32, i32
  }
  func.func @transform_3(%arg0: i32, %arg1: i32) -> (i32, i32) {
    %c0_i32 = arith.constant 0 : i32
    %c0_i32_0 = arith.constant 0 : i32
    %c0_i32_1 = arith.constant 0 : i32
    return %c0_i32, %c0_i32_0 : i32, i32
  }
  func.func @transform_4(%arg0: i32, %arg1: i32) -> (i32, i32, i32) {
    %c0_i32 = arith.constant 0 : i32
    %c0_i32_0 = arith.constant 0 : i32
    return %arg0, %c0_i32, %arg1 : i32, i32, i32
  }
  func.func @transform_5(%arg0: i32, %arg1: i32) -> (i32, i32, i32) {
    %c0_i32 = arith.constant 0 : i32
    %c0_i32_0 = arith.constant 0 : i32
    return %arg0, %c0_i32, %arg1 : i32, i32, i32
  }
  func.func @transform_6(%arg0: i32, %arg1: i32) -> (i32, i32, i32, i32) {
    %c0_i32 = arith.constant 0 : i32
    %c0_i32_0 = arith.constant 0 : i32
    %c0_i32_1 = arith.constant 0 : i32
    return %arg0, %arg1, %c0_i32, %c0_i32_0 : i32, i32, i32, i32
  }
}

</mosaic_0001>

<bundles_post_ra>
// kernel: tpu_custom_call.1
= control target key start
LH: loop header
LB: loop body
LE: loop exit
PB: predicated region body
PF: predicated region fallthrough
CT: control target
= control target key end

     0   :  { %s1613_s0 = inlined_call_operand.vmem [shape: f32[2,8,256], index: 0, kind: input, shape index: {}]   ;;  %s1614_s1 = inlined_call_operand.vmem [shape: f32[64,8], index: 1, kind: input, shape index: {}]   ;;  %s1615_s2 = inlined_call_operand.vmem [shape: f32[8,64], index: 2, kind: input, shape index: {}]   ;;  %s1616_s3 = inlined_call_operand.vmem [shape: f32[64,1], index: 3, kind: input, shape index: {}]   ;;  %s1617_s4 = inlined_call_operand.hbm [shape: s32[2,1,256], index: 4, kind: output, shape index: {0}]   ;;  %s1618_s5 = inlined_call_operand.hbm [shape: f32[2,8,256], index: 5, kind: output, shape index: {1}]   ;;  %s1619_s6 = inlined_call_operand.vmem [shape: f32[2,1,1,1], index: 6, kind: output, shape index: {2}]  }
   0x1   :  { %1620 = sst [smem:[#allocation8_spill]] %s1613_s0 }
   0x2   :  { %1621 = sst [smem:[#allocation9_spill]] %s1614_s1 }
   0x3   :  { %12 = vsyncpa [#allocation3], 0 }
   0x4   :  { %14 = vsyncpa [#allocation3 + $0x1], 0 }
   0x5   :  { %15 = vsyncpa [#allocation5], 0 }
   0x6   :  { %17 = vsyncpa [#allocation5 + $0x1], 0  ;;  %s1277_s21 = smov 0   ;;  %s1279_s22 = smov 0  }
   0x7   :  { %s1281_s23 = smov 0   ;;  %s1283_s24 = smov 0  }
   0x8   :  { %s1285_s25 = smov 0   ;;  %s1287_s26 = smov 0  }
   0x9 LB: > { %s981_s27 = sadd.s32 4294967295, %s1234_s26   ;;  %s982_s28 = sadd.s32 4294967294, %s1234_s26   ;;  %s1234_s26 = sphi %s1287_s26, %s23_s26   ;;  %s1230_s25 = sphi %s1285_s25, %s1630_s25   ;;  %s1226_s24 = sphi %s1283_s24, %s1629_s24   ;;  %s1222_s23 = sphi %s1281_s23, %s1628_s23   ;;  %s1218_s22 = sphi %s1279_s22, %s1627_s22   ;;  %s1214_s21 = sphi %s1277_s21, %s1626_s21  }
   0xa   : > { %s35_s29 = sadd.s32 1, %s1230_s25  ;;  %s135_s30 = sadd.s32 1, %s1222_s23 }
   0xb   : > { %p37_p0 = scmp.ge.s32.totalorder %s35_s29, 2  ;;  %p145_p1 = scmp.ne.s32.totalorder %s1222_s23, %s1218_s22 }
   0xc   : > { %p146_p2 = scmp.eq.s32.totalorder %s981_s27, 1  ;;  %p151_p3 = scmp.ne.s32.totalorder %s1218_s22, %s1214_s21 }
   0xd   : > { %s1632_s29 = smov (%p37_p0, %s35_s29), 0  ;;  %p152_p5 = scmp.eq.s32.totalorder %s982_s28, 1 }
   0xe   : > { %p1317_p4 = por %p146_p2, %p145_p1  ;;  %s130_s8 = ssub.s32 %s1230_s25, %s1632_s29 }
   0xf   : > { %p985_p6 = scmp.ge.s32.totalorder %s1234_s26, 1  ;;  %p133_p7 = scmp.eq.s32.totalorder %s130_s8, 0 }
  0x10   : > { %p1324_p8 = por %p152_p5, %p151_p3  ;;  %p248_p9 = scmp.lt.s32.totalorder %s1234_s26, 3 }
  0x11   : > { %s1330_s10 = scalar_select %p133_p7, %s1222_s23, %s135_s30  }
  0x12   : > { %p249_p10 = pnand %p985_p6, %p248_p9 }
  0x13   : > { %p294_p11 = scmp.lt.s32.totalorder (!%p249_p10), %s1226_s24, 1  ;;  %v1236_v0 = vmov (!%p249_p10), 0.0   ;;  %v1237_v1 = vmov (!%p249_p10), 0   ;;  %v322_v2 = vld [vmem:[%s1616_s3] sm:$0xff] (!%p249_p10)  ;;  %v324_v3 = vld [vmem:[%s1616_s3 + $0x10] sm:$0xff] (!%p249_p10)  ;;  %v323_v4 = vld [vmem:[%s1616_s3 + $0x8] sm:$0xff] (!%p249_p10) }
  0x14   : > { %252 = sbr.rel (%p249_p10) target bundleno = 714 (0x2ca), region = 36  ;;  %419 = vmatprep.mubr.f32.mxu0 (!%p249_p10), %v1236_v0  ;;  %773 = vmatprep.mubr.f32.mxu1 (!%p249_p10), %v1236_v0  ;;  %s1624_s0 = sld [smem:[#allocation8_spill]] (!%p249_p10)  ;;  %v325_v5 = vld [vmem:[%s1616_s3 + $0x18] sm:$0xff] (!%p249_p10)  ;;  %vm330_vm0 = vcmask (!%p249_p10), 64512   ;;  %v326_v9 = vld [vmem:[%s1616_s3 + $0x20] sm:$0xff] (!%p249_p10)  ;;  %v327_v10 = vld [vmem:[%s1616_s3 + $0x28] sm:$0xff] (!%p249_p10) }
  0x15   : > { %1122 = vset.pattern.permute.xlu0 (!%p249_p10), %v1237_v1  ;;  %1123 = vset.pattern.permute.xlu1 (!%p249_p10), %v1237_v1  ;;  %s1625_s1 = sld [smem:[#allocation9_spill]] (!%p249_p10)  ;;  %v328_v12 = vld [vmem:[%s1616_s3 + $0x30] sm:$0xff] (!%p249_p10)  ;;  %v329_v13 = vld [vmem:[%s1616_s3 + $0x38] sm:$0xff] (!%p249_p10)  ;;  %s1509_s28 = sand.u32 (!%p249_p10), 1, %s1218_s22  }
  0x16   : > { %470 = vperm.xlu0 (!%p249_p10), %1122, %v322_v2   ;;  %480 = vperm.xlu1 (!%p249_p10), %1123, %v324_v3   ;;  %s986_s30 = sshll.u32 (!%p249_p10), %s1509_s28, 1  ;;  %s987_s14 = sshll.u32 (!%p249_p10), %s1509_s28, 4 }
  0x17   : > { %s277_s8 = scalar_lea.vmem (!%p249_p10), [#allocation2], %s986_s30  ;;  %s1532_s15 = scalar_lea.vmem (!%p249_p10), [#allocation4], %s987_s14 }
  0x18   : > { %s825_s20 = sshll.u32 (!%p249_p10), %s277_s8, 4  ;;  %s1240_s12 = smov (!%p249_p10), [#allocation2]   ;;  %s826_s20 = int_to_ptr.vmem [resolvable:$true] %s825_s20 }
  0x19   : > { %s1124_s30 = scalar_lea.vmem (!%p249_p10), %s826_s20, 32  ;;  %s1128_s13 = sshll.u32 (!%p249_p10), %s1240_s12, 4  ;;  %s1129_s13 = int_to_ptr.vmem [resolvable:$false] %s1128_s13 }
  0x1a   : > { %475 = vperm.xlu0 (!%p249_p10), %1122, %v323_v4   ;;  %485 = vperm.xlu1 (!%p249_p10), %1123, %v325_v5   ;;  %p1125_p12 = scmp.ne.s32.totalorder (!%p249_p10), %s826_s20, %s1124_s30  ;;  %s1130_s14 = scalar_lea.vmem (!%p249_p10), %s1129_s13, 64 }
  0x1b   : > { %s1334_s11 = scalar_select %p294_p11, %s1226_s24, 1  ;;  %v313_v8 = vld [vmem:[%s1625_s1] sm:$0xff]  ;;  %v314_v11 = vld [vmem:[%s1625_s1 + $0x8] sm:$0xff]  ;;  %v315_v14 = vld [vmem:[%s1625_s1 + $0x10] sm:$0xff] }
  0x1c   : > { %v316_v15 = vld [vmem:[%s1625_s1 + $0x18] sm:$0xff]  ;;  %v317_v16 = vld [vmem:[%s1625_s1 + $0x20] sm:$0xff]  ;;  %v318_v17 = vld [vmem:[%s1625_s1 + $0x28] sm:$0xff]  ;;  %p1126_p13 = pnand %p1125_p12, %p1317_p4  ;;  %p1131_p1 = scmp.lt.s32.totalorder %s826_s20, %s1129_s13 }
  0x1d   : > { %s1039_s16 = sshll.u32 %s1334_s11, 4  ;;  %v319_v18 = vld [vmem:[%s1625_s1 + $0x30] sm:$0xff]  ;;  %v320_v19 = vld [vmem:[%s1625_s1 + $0x38] sm:$0xff]  ;;  %p1132_p2 = scmp.lt.s32.totalorder %s1130_s14, %s1124_s30 }
  0x1e   : > { %s301_s27 = scalar_lea.vmem %s1624_s0, %s1039_s16  ;;  %490 = vperm.xlu0 %1122, %v326_v9   ;;  %495 = vperm.xlu1 %1123, %v327_v10   ;;  %s1040_s16 = sshll.u32 %s1226_s24, 5 }
  0x1f   : > { %v1352_v6 = vld [vmem:[%s301_s27 + $0x8] sm:$0xff]  ;;  %v1354_v7 = vld [vmem:[%s301_s27] sm:$0xff]  ;;  %s1542_s19 = scalar_lea.hbm %s1617_s4, %s1040_s16  ;;  %s798_s27 = scalar_lea.sflag [#allocation3], %s1509_s28 }
  0x20   : > { %355 = vmatprep.subr.mxu0 %v1352_v6  ;;  %p1127_p0 = pneg %p1126_p13  ;;  %p1133_p3 = por %p1132_p2, %p1131_p1 }
  0x21   : > { %356 = vmatpush1.msra.mxu0 %v1354_v7 }
  0x22   : > { %990 = vmatmul.mubr.msk.f32.vlgmr.msra.gmra.mrb[0].mxu0 %vm330_vm0, %v313_v8  ;;  %500 = vperm.xlu0 %1122, %v328_v12   ;;  %p1134_p5 = pnand %p1133_p3, %p1127_p0 }
  0x23   : > { %425 = vmatprep.mubr.f32.mxu0 %v1236_v0  ;;  %505 = vperm.xlu1 %1123, %v329_v13   ;;  %v524_v13 = vlaneseq }
  0x26   : > { %991 = vmatmul.mubr.msk.f32.gmra.mrb[2].mxu0 %vm330_vm0, %v314_v11 }
  0x27   : > { %431 = vmatprep.mubr.f32.mxu0 %v1236_v0 }
  0x2a   : > { %992 = vmatmul.mubr.msk.f32.gmra.mrb[4].mxu0 %vm330_vm0, %v315_v14 }
  0x2b   : > { %437 = vmatprep.mubr.f32.mxu0 %v1236_v0 }
  0x2e   : > { %993 = vmatmul.mubr.msk.f32.gmra.mrb[6].mxu0 %vm330_vm0, %v316_v15 }
  0x2f   : > { %443 = vmatprep.mubr.f32.mxu0 %v1236_v0 }
  0x32   : > { %994 = vmatmul.mubr.msk.f32.gmra.mrb[8].mxu0 %vm330_vm0, %v317_v16 }
  0x33   : > { %449 = vmatprep.mubr.f32.mxu0 %v1236_v0 }
  0x36   : > { %995 = vmatmul.mubr.msk.f32.gmra.mrb[10].mxu0 %vm330_vm0, %v318_v17 }
  0x37   : > { %455 = vmatprep.mubr.f32.mxu0 %v1236_v0 }
  0x3a   : > { %996 = vmatmul.mubr.msk.f32.gmra.mrb[12].mxu0 %vm330_vm0, %v319_v18  ;;  %v1439_v18 = vshrl.u32 %v524_v13, 7 }
  0x3b   : > { %461 = vmatprep.mubr.f32.mxu0 %v1236_v0 }
  0x3e   : > { %997 = vmatmul.mubr.msk.f32.gmra.mrb[14].mxu0 %vm330_vm0, %v320_v19 }
  0x95   : > { %v471_v22 = vpop.permute.xlu0 %470  ;;  %v481_v25 = vpop.permute.xlu1 %480 }
  0x99   : > { %v476_v31 = vpop.permute.xlu0 %475  ;;  %v486_v34 = vpop.permute.xlu1 %485 }
  0x9d   : > { %v491_v43 = vpop.permute.xlu0 %490  ;;  %v496_v50 = vpop.permute.xlu1 %495 }
  0xa1   : > { %v501_v57 = vpop.permute.xlu0 %500 }
  0xa2   : > { %v506_v0 = vpop.permute.xlu1 %505 }
  0xf5   : > { %v421_v20 = vpop.f32.mrb[0].mxu0 }
  0xf6   : > { %v423_v21 = vpop.f32.mrb[1].mxu0  ;;  %v1402_v27 = vsub.f32 %v421_v20, %v471_v22 }
  0xf7   : > { %v1406_v30 = vsub.f32 %v423_v21, %v471_v22 }
  0xf9   : > { %v427_v23 = vpop.f32.mrb[2].mxu0 }
  0xfa   : > { %v429_v24 = vpop.f32.mrb[3].mxu0  ;;  %v1414_v37 = vsub.f32 %v427_v23, %v476_v31  ;;  %v1442_v23 = vadd.s32 8, %v1439_v18 }
  0xfb   : > { %v1418_v40 = vsub.f32 %v429_v24, %v476_v31 }
  0xfd   : > { %v433_v26 = vpop.f32.mrb[4].mxu0 }
  0xfe   : > { %v1404_v28 = vsub.f32 %v433_v26, %v481_v25  ;;  %v435_v29 = vpop.f32.mrb[5].mxu0  ;;  %v1448_v26 = vadd.s32 24, %v1439_v18 }
  0xff   : > { %v1408_v32 = vsub.f32 %v435_v29, %v481_v25  ;;  %v1445_v25 = vadd.s32 16, %v1439_v18  ;;  %v1451_v29 = vadd.s32 32, %v1439_v18 }
 0x100   : > { %v533_v33 = vmax.f32 %v1402_v27, %v1404_v28 }
 0x101   : > { %v546_v35 = vmax.f32 %v1406_v30, %v1408_v32  ;;  %v439_v36 = vpop.f32.mrb[6].mxu0 }
 0x102   : > { %v1416_v38 = vsub.f32 %v439_v36, %v486_v34  ;;  %v441_v39 = vpop.f32.mrb[7].mxu0 }
 0x103   : > { %v1420_v41 = vsub.f32 %v441_v39, %v486_v34  ;;  %v1457_v34 = vadd.s32 48, %v1439_v18 }
 0x104   : > { %v534_v42 = vmax.f32 %v1414_v37, %v1416_v38 }
 0x105   : > { %v547_v44 = vmax.f32 %v1418_v40, %v1420_v41  ;;  %v445_v45 = vpop.f32.mrb[8].mxu0 }
 0x106   : > { %v516_v46 = vsub.f32 %v445_v45, %v491_v43  ;;  %v447_v47 = vpop.f32.mrb[9].mxu0 }
 0x107   : > { %v1426_v48 = vsub.f32 %v447_v47, %v491_v43 }
 0x108   : > { %v535_v49 = vmax.f32 %v533_v33, %v516_v46  ;;  %v1454_v33 = vadd.s32 40, %v1439_v18 }
 0x109   : > { %v548_v51 = vmax.f32 %v546_v35, %v1426_v48  ;;  %v451_v52 = vpop.f32.mrb[10].mxu0  ;;  %v1460_v35 = vadd.s32 56, %v1439_v18 }
 0x10a   : > { %v518_v53 = vsub.f32 %v451_v52, %v496_v50  ;;  %v453_v54 = vpop.f32.mrb[11].mxu0 }
 0x10b   : > { %v1429_v55 = vsub.f32 %v453_v54, %v496_v50 }
 0x10c   : > { %v536_v56 = vmax.f32 %v534_v42, %v518_v53 }
 0x10d   : > { %v549_v58 = vmax.f32 %v547_v44, %v1429_v55  ;;  %v457_v59 = vpop.f32.mrb[12].mxu0 }
 0x10e   : > { %v520_v60 = vsub.f32 %v457_v59, %v501_v57  ;;  %v459_v61 = vpop.f32.mrb[13].mxu0 }
 0x10f   : > { %v1432_v62 = vsub.f32 %v459_v61, %v501_v57 }
 0x110   : > { %v537_v63 = vmax.f32 %v535_v49, %v520_v60 }
 0x111   : > { %v550_v1 = vmax.f32 %v548_v51, %v1432_v62  ;;  %v463_v2 = vpop.f32.mrb[14].mxu0 }
 0x112   : > { %v522_v3 = vsub.f32 %v463_v2, %v506_v0  ;;  %v465_v4 = vpop.f32.mrb[15].mxu0 }
 0x113   : > { %v1435_v5 = vsub.f32 %v465_v4, %v506_v0 }
 0x114   : > { %v538_v8 = vmax.f32 %v536_v56, %v522_v3 }
 0x115   : > { %v551_v9 = vmax.f32 %v549_v58, %v1435_v5 }
 0x116   : > { %v539_v10 = vmax.f32 %v537_v63, %v538_v8 }
 0x117   : > { %v552_v11 = vmax.f32 %v550_v1, %v551_v9  ;;  %v1238_v9 = vmov 1966171168  }
 0x118   : > { %v540_v12 = vrot.slane %v539_v10, 4 }
 0x119   : > { %v553_v14 = vrot.slane %v552_v11, 4 }
 0x11a   : > { %v541_v15 = vmax.f32 %v539_v10, %v540_v12 }
 0x11b   : > { %v554_v16 = vmax.f32 %v552_v11, %v553_v14 }
 0x11c   : > { %v542_v17 = vrot.slane %v541_v15, 2 }
 0x11d   : > { %v555_v19 = vrot.slane %v554_v16, 2 }
 0x11e   : > { %v543_v20 = vmax.f32 %v541_v15, %v542_v17 }
 0x11f   : > { %v556_v21 = vmax.f32 %v554_v16, %v555_v19  ;;  %v1239_v19 = vmov 1.0|1.0  }
 0x120   : > { %v544_v22 = vrot.slane %v543_v20, 1 }
 0x121   : > { %v557_v24 = vrot.slane %v556_v21, 1 }
 0x122   : > { %v545_v31 = vmax.f32 %v543_v20, %v544_v22 }
 0x123   : > { %v558_v36 = vmax.f32 %v556_v21, %v557_v24 }
 0x124   : > { %vm559_vm1 = vcmp.ge.f32.partialorder %v1402_v27, %v545_v31  ;;  %vm561_vm2 = vcmp.ge.f32.partialorder %v1414_v37, %v545_v31  ;;  %vm563_vm3 = vcmp.ge.f32.partialorder %v1404_v28, %v545_v31  ;;  %vm565_vm4 = vcmp.ge.f32.partialorder %v1416_v38, %v545_v31 }
 0x125   : > { %vm567_vm5 = vcmp.ge.f32.partialorder %v516_v46, %v545_v31  ;;  %vm569_vm6 = vcmp.ge.f32.partialorder %v518_v53, %v545_v31  ;;  %vm571_vm7 = vcmp.ge.f32.partialorder %v520_v60, %v545_v31  ;;  %vm573_vm8 = vcmp.ge.f32.partialorder %v522_v3, %v545_v31 }
 0x126   : > { %v575_v39 = vsel %vm559_vm1, %v1439_v18, 64  ;;  %v577_v42 = vsel %vm561_vm2, %v1442_v23, 64  ;;  %v579_v43 = vsel %vm563_vm3, %v1445_v25, 64  ;;  %v581_v44 = vsel %vm565_vm4, %v1448_v26, 64 }
 0x127   : > { %v583_v27 = vsel %vm567_vm5, %v1451_v29, 64  ;;  %v585_v37 = vsel %vm569_vm6, %v1454_v33, 64  ;;  %v587_v28 = vsel %vm571_vm7, %v1457_v34, 64  ;;  %v589_v38 = vsel %vm573_vm8, %v1460_v35, 64 }
 0x128   : > { %vm591_vm9 = vcmp.lt.s32.totalorder %v575_v39, %v579_v43  ;;  %vm593_vm10 = vcmp.lt.s32.totalorder %v577_v42, %v581_v44  ;;  %vm560_vm11 = vcmp.ge.f32.partialorder %v1406_v30, %v558_v36  ;;  %vm562_vm12 = vcmp.ge.f32.partialorder %v1418_v40, %v558_v36 }
 0x129   : > { %v592_v45 = vsel %vm591_vm9, %v575_v39, %v579_v43  ;;  %v594_v46 = vsel %vm593_vm10, %v577_v42, %v581_v44  ;;  %vm564_vm13 = vcmp.ge.f32.partialorder %v1408_v32, %v558_v36  ;;  %vm566_vm14 = vcmp.ge.f32.partialorder %v1420_v41, %v558_v36 }
 0x12a   : > { %vm595_vm15 = vcmp.lt.s32.totalorder %v592_v45, %v583_v27  ;;  %vm597_vm0 = vcmp.lt.s32.totalorder %v594_v46, %v585_v37  ;;  %vm568_vm1 = vcmp.ge.f32.partialorder %v1426_v48, %v558_v36  ;;  %vm570_vm2 = vcmp.ge.f32.partialorder %v1429_v55, %v558_v36 }
 0x12b   : > { %v596_v47 = vsel %vm595_vm15, %v592_v45, %v583_v27  ;;  %v598_v49 = vsel %vm597_vm0, %v594_v46, %v585_v37  ;;  %vm572_vm3 = vcmp.ge.f32.partialorder %v1432_v62, %v558_v36  ;;  %vm574_vm4 = vcmp.ge.f32.partialorder %v1435_v5, %v558_v36 }
 0x12c   : > { %vm599_vm5 = vcmp.lt.s32.totalorder %v596_v47, %v587_v28  ;;  %vm601_vm6 = vcmp.lt.s32.totalorder %v598_v49, %v589_v38  ;;  %v576_v50 = vsel %vm560_vm11, %v1439_v18, 64  ;;  %v578_v51 = vsel %vm562_vm12, %v1442_v23, 64 }
 0x12d   : > { %v600_v52 = vsel %vm599_vm5, %v596_v47, %v587_v28  ;;  %v602_v53 = vsel %vm601_vm6, %v598_v49, %v589_v38  ;;  %v580_v54 = vsel %vm564_vm13, %v1445_v25, 64  ;;  %v582_v56 = vsel %vm566_vm14, %v1448_v26, 64 }
 0x12e   : > { %vm603_vm7 = vcmp.lt.s32.totalorder %v600_v52, %v602_v53  ;;  %v584_v30 = vsel %vm568_vm1, %v1451_v29, 64  ;;  %vm614_vm8 = vcmp.lt.s32.totalorder %v576_v50, %v580_v54  ;;  %vm616_vm9 = vcmp.lt.s32.totalorder %v578_v51, %v582_v56 }
 0x12f   : > { %v604_v57 = vsel %vm603_vm7, %v600_v52, %v602_v53  ;;  %v586_v58 = vsel %vm570_vm2, %v1454_v33, 64  ;;  %v615_v59 = vsel %vm614_vm8, %v576_v50, %v580_v54  ;;  %v617_v32 = vsel %vm616_vm9, %v578_v51, %v582_v56 }
 0x130   : > { %v605_v40 = vrot.slane %v604_v57, 4  ;;  %v588_v41 = vsel %vm572_vm3, %v1457_v34, 64  ;;  %vm618_vm10 = vcmp.lt.s32.totalorder %v615_v59, %v584_v30  ;;  %vm620_vm11 = vcmp.lt.s32.totalorder %v617_v32, %v586_v58 }
 0x131   : > { %v590_v48 = vsel %vm574_vm4, %v1460_v35, 64  ;;  %v619_v60 = vsel %vm618_vm10, %v615_v59, %v584_v30  ;;  %v621_v61 = vsel %vm620_vm11, %v617_v32, %v586_v58  ;;  %v639_v5 = vunpack.c.l.s4 %v1238_v9 }
 0x132   : > { %vm606_vm12 = vcmp.lt.s32.totalorder %v604_v57, %v605_v40  ;;  %vm622_vm13 = vcmp.lt.s32.totalorder %v619_v60, %v588_v41  ;;  %vm624_vm14 = vcmp.lt.s32.totalorder %v621_v61, %v590_v48 }
 0x133   : > { %v607_v63 = vsel %vm606_vm12, %v604_v57, %v605_v40  ;;  %v623_v0 = vsel %vm622_vm13, %v619_v60, %v588_v41  ;;  %v625_v1 = vsel %vm624_vm14, %v621_v61, %v590_v48  ;;  %v640_v12 = vunpack.c.0.s8 %v639_v5 }
 0x134   : > { %v608_v55 = vrot.slane %v607_v63, 2  ;;  %vm626_vm15 = vcmp.lt.s32.totalorder %v623_v0, %v625_v1 }
 0x135   : > { %v627_v2 = vsel %vm626_vm15, %v623_v0, %v625_v1  ;;  %v643_v17 = vsub.s32 %v640_v12, %v1439_v18 }
 0x136   : > { %vm609_vm0 = vcmp.lt.s32.totalorder %v607_v63, %v608_v55  ;;  %v628_v3 = vrot.slane %v627_v2, 4 }
 0x137   : > { %v610_v62 = vsel %vm609_vm0, %v607_v63, %v608_v55 }
 0x138   : > { %v611_v4 = vrot.slane %v610_v62, 1  ;;  %vm629_vm1 = vcmp.lt.s32.totalorder %v627_v2, %v628_v3 }
 0x139   : > { %v630_v8 = vsel %vm629_vm1, %v627_v2, %v628_v3 }
 0x13a   : > { %v631_v10 = vrot.slane %v630_v8, 2  ;;  %vm612_vm2 = vcmp.lt.s32.totalorder %v610_v62, %v611_v4 }
 0x13b   : > { %v613_v14 = vsel %vm612_vm2, %v610_v62, %v611_v4  ;;  %vm654_vm2 = vcmp.lt.s32.totalorder %v524_v13, 256  ;;  %v321_v13 = vld [vmem:[%s1615_s2] sm:$0xff] }
 0x13c   : > { %vm632_vm3 = vcmp.lt.s32.totalorder %v630_v8, %v631_v10  ;;  %vm657_vm5 = vcmp.eq.s32.totalorder %v1439_v18, %v613_v14  ;;  %vm659_vm6 = vcmp.eq.s32.totalorder %v1442_v23, %v613_v14  ;;  %vm661_vm14 = vcmp.eq.s32.totalorder %v1445_v25, %v613_v14 }
 0x13d   : > { %v633_v11 = vsel %vm632_vm3, %v630_v8, %v631_v10  ;;  %vm1044_vm12 = vmpackc.low %vm659_vm6, %vm657_vm5  ;;  %vm663_vm15 = vcmp.eq.s32.totalorder %v1448_v26, %v613_v14  ;;  %vm665_vm5 = vcmp.eq.s32.totalorder %v1451_v29, %v613_v14  ;;  %vm667_vm6 = vcmp.eq.s32.totalorder %v1454_v33, %v613_v14 }
 0x13e   : > { %v634_v15 = vrot.slane %v633_v11, 1  ;;  %vm1048_vm3 = vmpackc.low %vm663_vm15, %vm661_vm14  ;;  %vm705_vm14 = vcmask 523264  }
 0x140   : > { %vm635_vm4 = vcmp.lt.s32.totalorder %v633_v11, %v634_v15 }
 0x141   : > { %v636_v16 = vsel %vm635_vm4, %v633_v11, %v634_v15 }
 0x142   : > { %vm658_vm7 = vcmp.eq.s32.totalorder %v1439_v18, %v636_v16  ;;  %vm660_vm8 = vcmp.eq.s32.totalorder %v1442_v23, %v636_v16  ;;  %vm662_vm9 = vcmp.eq.s32.totalorder %v1445_v25, %v636_v16  ;;  %vm664_vm10 = vcmp.eq.s32.totalorder %v1448_v26, %v636_v16 }
 0x143   : > { %vm1042_vm11 = vmpackc.low %vm660_vm8, %vm658_vm7  ;;  %v637_v20 = vcombine.low %v613_v14, %v636_v16  ;;  %vm666_vm0 = vcmp.eq.s32.totalorder %v1451_v29, %v636_v16  ;;  %vm668_vm1 = vcmp.eq.s32.totalorder %v1454_v33, %v636_v16  ;;  %vm670_vm7 = vcmp.eq.s32.totalorder %v1457_v34, %v636_v16 }
 0x144   : > { %1043 = vmatprep.subr.msk.bf16.mxu1 %vm1042_vm11, %v1239_v19  ;;  %vm1046_vm13 = vmpackc.low %vm664_vm10, %vm662_vm9  ;;  %vm672_vm8 = vcmp.eq.s32.totalorder %v1460_v35, %v636_v16  ;;  %vm669_vm11 = vcmp.eq.s32.totalorder %v1457_v34, %v613_v14 }
 0x145   : > { %1045 = vmatpush1.bf16.msk.msra.mxu1 %vm1044_vm12, %v1239_v19  ;;  %v644_v18 = vrot.slane %v637_v20, %v643_v17  ;;  %vm1050_vm4 = vmpackc.low %vm668_vm1, %vm666_vm0  ;;  %vm671_vm12 = vcmp.eq.s32.totalorder %v1460_v35, %v613_v14 }
 0x146   : > { %1047 = vmatprep.subr.msk.bf16.mxu1 %vm1046_vm13, %v1239_v19  ;;  %vm1052_vm9 = vmpackc.low %vm667_vm6, %vm665_vm5 }
 0x147   : > { %v651_v21 = vrot.slane %v644_v18, %v643_v17  ;;  %vm1054_vm10 = vmpackc.low %vm672_vm8, %vm670_vm7 }
 0x148   : > { %vm1056_vm13 = vmpackc.low %vm671_vm12, %vm669_vm11 }
 0x149   : > { %1049 = vmatpush1.bf16.msk.msra.mxu1 %vm1048_vm3, %v1239_v19  ;;  %656 = vst.msk [vmem:[%s277_s8] sm:$0x3] %vm654_vm2, %v651_v21 }
 0x14a   : > { %1051 = vmatprep.subr.msk.bf16.mxu1 %vm1050_vm4, %v1239_v19 }
 0x14d   : > { %1053 = vmatpush1.bf16.msk.msra.mxu1 %vm1052_vm9, %v1239_v19 }
 0x14e   : > { %1055 = vmatprep.subr.msk.bf16.mxu1 %vm1054_vm10, %v1239_v19 }
 0x151   : > { %1057 = vmatpush1.bf16.msk.msra.mxu1 %vm1056_vm13, %v1239_v19 }
 0x154   : > { %1030 = vmatmul.mubr.msk.f32.vlgmr.msra.gmra.mrb[0].mxu1 %vm705_vm14, %v321_v13 }
 0x227   : > { %v775_v22 = vpop.f32.mrb[0].mxu1 }
 0x228   : > { %780 = vst [vmem:[%s1532_s15] sm:$0xff] %v775_v22  ;;  %v782_v23 = vsub.f32 %v1354_v7, %v775_v22  ;;  %v777_v24 = vpop.f32.mrb[1].mxu1 }
 0x229   : > { %781 = vst [vmem:[%s1532_s15 + $0x8] sm:$0xff] %v777_v24  ;;  %v783_v25 = vsub.f32 %v1352_v6, %v777_v24 }
 0x22a   : > { %v784_v26 = vmul.f32 %v782_v23, %v782_v23 }
 0x22b   : > { %v785_v29 = vmul.f32 %v783_v25, %v783_v25 }
 0x22d   : > { %v786_v31 = vadd.f32 %v785_v29, %v784_v26 }
 0x22f   : > { %787 = vadd.xlane.f32.xlu0 %v786_v31 }
 0x230   : > { %1137 = shalt.err (!%p1134_p5)
}
 0x231   : > { %s1138_s8 = scalar_lea.hbm %s1542_s19, 32  ;;  %s1142_s18 = scalar_lea.hbm %s1617_s4, 64 }
 0x232   : > { %p1139_p6 = scmp.ne.s32.totalorder %s1542_s19, %s1138_s8  ;;  %p1143_p10 = scmp.lt.u32.totalorder %s1542_s19, %s1617_s4 }
 0x233   : > { %p1144_p11 = scmp.lt.u32.totalorder %s1142_s18, %s1138_s8  ;;  %p1146_p13 = scmp.lt.u32.totalorder %s1138_s8, %s1542_s19 }
 0x234   : > { %p1140_p7 = pnand %p1139_p6, %p1317_p4 }
 0x235   : > { %p1145_p12 = por %p1144_p11, %p1143_p10 }
 0x236   : > { %p1141_p9 = pneg %p1140_p7 }
 0x237   : > { %p1147_p0 = por %p1146_p13, %p1145_p12 }
 0x239   : > { %p1148_p1 = pnand %p1147_p0, %p1141_p9 }
 0x23b   : > { %1151 = shalt.err (!%p1148_p1)
}
 0x23c   : > { %1058 = dma.vmem_to_hbm [thread:$0]  (%p1317_p4), %s826_s20, 32, %s1542_s19, %s798_s27  }
 0x23d   : > { %s1041_s30 = sshll.u32 %s1226_s24, 8  ;;  %s841_s14 = sshll.u32 %s1532_s15, 4  ;;  %s842_s14 = int_to_ptr.vmem [resolvable:$true] %s841_s14 }
 0x23e   : > { %s1567_s12 = scalar_lea.hbm %s1618_s5, %s1041_s30  ;;  %s803_s8 = scalar_lea.sflag [#allocation5], %s1509_s28 }
 0x23f   : > { %s1152_s18 = scalar_lea.vmem %s842_s14, 256  ;;  %s1241_s13 = smov [#allocation4]  }
 0x240   : > { %p1153_p2 = scmp.ne.s32.totalorder %s842_s14, %s1152_s18  ;;  %s1156_s0 = sshll.u32 %s1241_s13, 4  ;;  %s1157_s0 = int_to_ptr.vmem [resolvable:$false] %s1156_s0 }
 0x241   : > { %s1158_s1 = scalar_lea.vmem %s1157_s0, 512  ;;  %p1159_p6 = scmp.lt.s32.totalorder %s842_s14, %s1157_s0 }
 0x242   : > { %p1154_p3 = pnand %p1153_p2, %p1317_p4  ;;  %p1160_p7 = scmp.lt.s32.totalorder %s1158_s1, %s1152_s18 }
 0x244   : > { %p1155_p5 = pneg %p1154_p3  ;;  %p1161_p9 = por %p1160_p7, %p1159_p6 }
 0x246   : > { %p1162_p10 = pnand %p1161_p9, %p1155_p5 }
 0x248   : > { %1165 = shalt.err (!%p1162_p10)
}
 0x249   : > { %s1166_s24 = scalar_lea.hbm %s1567_s12, 256  ;;  %s1170_s19 = scalar_lea.hbm %s1618_s5, 512 }
 0x24a   : > { %p1167_p11 = scmp.ne.s32.totalorder %s1567_s12, %s1166_s24  ;;  %p1171_p0 = scmp.lt.u32.totalorder %s1567_s12, %s1618_s5 }
 0x24b   : > { %p1172_p1 = scmp.lt.u32.totalorder %s1170_s19, %s1166_s24  ;;  %p1174_p3 = scmp.lt.u32.totalorder %s1166_s24, %s1567_s12 }
 0x24c   : > { %p1168_p12 = pnand %p1167_p11, %p1317_p4 }
 0x24d   : > { %p1173_p2 = por %p1172_p1, %p1171_p0 }
 0x24e   : > { %p1169_p13 = pneg %p1168_p12 }
 0x24f   : > { %p1175_p5 = por %p1174_p3, %p1173_p2 }
 0x251   : > { %p1176_p6 = pnand %p1175_p5, %p1169_p13 }
 0x253   : > { %1179 = shalt.err (!%p1176_p6)
}
 0x254   : > { %1059 = dma.vmem_to_hbm [thread:$0]  (%p1317_p4), %s842_s14, 256, %s1567_s12, %s803_s8   ;;  %vm795_vm15 = vcmask 0  }
 0x255   : > { %s310_s30 = scalar_lea.vmem %s1619_s6, %s1334_s11 }
 0x2bc   : > { %v788_v6 = vpop.xlane.xlu0 %787 }
 0x2bd   : > { %v789_v7 = vrot.slane %v788_v6, 4 }
 0x2bf   : > { %v790_v33 = vadd.f32 %v789_v7, %v788_v6 }
 0x2c1   : > { %v791_v34 = vrot.slane %v790_v33, 2 }
 0x2c3   : > { %v792_v35 = vadd.f32 %v791_v34, %v790_v33 }
 0x2c5   : > { %v793_v36 = vrot.slane %v792_v35, 1 }
 0x2c7   : > { %v794_v39 = vadd.f32 %v793_v36, %v792_v35 }
 0x2c9   : > { %796 = vst.msk [vmem:[%s310_s30] sm:$0x1] %vm795_vm15, %v794_v39 }
 0x2ca PF: > { %p1069_p7 = scmp.ge.s32.totalorder %s1234_s26, 2  ;;  %s856_s7 = sand.u32 1, %s1214_s21  }
 0x2cb   : > { %s857_s14 = scalar_lea.sflag [#allocation3], %s856_s7 }
 0x2cc   : > { %p1063_p4 = pnand %p1069_p7, %p1324_p8 }
 0x2ce   : > { %1205 = dma.done.wait (!%p1063_p4), %s857_s14, 32  }
 0x2cf   : > { %1207 = vsyncadd (!%p1063_p4), %s857_s14, 4294967264  ;;  %s866_s16 = scalar_lea.sflag [#allocation5], %s856_s7 }
 0x2d0   : > { %1209 = dma.done.wait (!%p1063_p4), %s866_s16, 256  }
 0x2d1   : > { %1211 = vsyncadd (!%p1063_p4), %s866_s16, 4294967040  ;;  %s23_s26 = sadd.s32 1, %s1234_s26   ;;  %s1626_s21 = smov %s1218_s22 }
 0x2d2   : > { %p20_p9 = scmp.ge.s32.totalorder %s23_s26, 4   ;;  %s1627_s22 = smov %s1222_s23 }
 0x2d3   : > { %s1628_s23 = smov %s1330_s10  ;;  %s1629_s24 = smov %s1230_s25 }
 0x2d4   : > { %s1630_s25 = smov %s1632_s29  ;;  %22 = sbr.rel (!%p20_p9) target bundleno = 9 (0x9), region = 100 }
 0x2db   :  { %880 = vsyncpa [#allocation3], 1 }
 0x2dc   :  { %882 = vsyncpa [#allocation3 + $0x1], 1 }
 0x2dd   :  { %883 = vsyncpa [#allocation5], 1 }
 0x2de   :  { %885 = vsyncpa [#allocation5 + $0x1], 1 }

</bundles_post_ra>
